<compile_context>
chip_gen: v7x
topology: tpu7x:2x2x1
jax: 0.10.0
libtpu: 0.0.40
codegen_flags: <defaults>
</compile_context>

<pallas_src>
import jax
import jax.numpy as jnp
from jax import lax
from jax.experimental import pallas as pl
from jax.experimental.pallas import tpu as pltpu


def _round_up(x, m):
    return ((x + m - 1) // m) * m


def _cdiv(a, b):
    return -(-a // b)


# --------------------------------- kernels ----------------------------------

def _fh_kernel_fullk(x_ref, w_ref, b_ref, o_ref):
    # x_ref: [tm, nf]   w_ref: [tn, nf] (native torch [T, nf] layout)
    # Contracting dim 1 with dim 1 -> MXU loads the stationary operand
    # transposed for free (no per-tile XLU transpose).
    acc = lax.dot_general(
        x_ref[...], w_ref[...],
        dimension_numbers=(((1,), (1,)), ((), ())),
        preferred_element_type=jnp.float32)
    o_ref[...] = (acc + b_ref[...]).astype(o_ref.dtype)


def _fh_kernel_ksplit(x_ref, w_ref, b_ref, o_ref, acc_ref):
    # Fallback path when nf is too large for a single K tile.
    k = pl.program_id(2)

    @pl.when(k == 0)
    def _():
        # Initialise the accumulator with the broadcast bias
        # (saves the extra VPU add at finalize).
        acc_ref[...] = jnp.broadcast_to(b_ref[...], acc_ref.shape).astype(jnp.float32)

    acc_ref[...] += lax.dot_general(
        x_ref[...], w_ref[...],
        dimension_numbers=(((1,), (1,)), ((), ())),
        preferred_element_type=jnp.float32)

    @pl.when(k == pl.num_programs(2) - 1)
    def _():
        o_ref[...] = acc_ref[...].astype(o_ref.dtype)


# ----------------------------- parameter prep -------------------------------

def prepare_flatten_head_params(weight, bias, *, compute_dtype=jnp.bfloat16):
    """One-time prep (call at init, NOT per forward): cast + pad to lane/sublane
    friendly shapes. weight: [T, nf], bias: [T] -> (w [T_pad, nf_pad], b [1, T_pad])."""
    T, nf = weight.shape
    T_pad = _round_up(T, 128)
    nf_pad = _round_up(nf, 128)
    w = weight.astype(compute_dtype)
    if (T_pad, nf_pad) != (T, nf):
        w = jnp.pad(w, ((0, T_pad - T), (0, nf_pad - nf)))
    b = bias.astype(jnp.float32)
    if T_pad != T:
        b = jnp.pad(b, (0, T_pad - T))
    return w, b.reshape(1, T_pad)


# ------------------------------- tile choice --------------------------------

def _choose_tiles(M, T_pad, nf_pad, in_itemsize):
    # tm: cap near 512, multiple of 16 (bf16 sublane packing), minimal padding.
    m_tiles = max(1, _cdiv(M, 512))
    tm = _round_up(_cdiv(M, m_tiles), 16)
    M_pad = tm * m_tiles

    # tn: largest lane-dense candidate dividing T_pad; if the parallel tile
    # count would be odd, prefer a size that makes it even (v7x has 2 TCs).
    cands = [c for c in (512, 384, 256, 128) if T_pad % c == 0]
    tn = cands[0]
    if (m_tiles * (T_pad // tn)) % 2 == 1:
        for c in cands:
            if (m_tiles * (T_pad // c)) % 2 == 0:
                tn = c
                break

    # tk: full nf if the double-buffered x/w tiles fit in ~24 MiB (headroom
    # inside a 32 MiB scoped-VMEM limit on every generation incl. v7x's 64 MiB
    # physical); otherwise the largest 128-multiple divisor of nf_pad that fits.
    input_budget = 24 * 1024 * 1024
    tk_cap = max(128, input_budget // (2 * (tm + tn) * in_itemsize))
    if nf_pad <= tk_cap:
        tk = nf_pad
    else:
        q = nf_pad // 128
        d = 1
        for cand in range(min(q, tk_cap // 128), 0, -1):
            if q % cand == 0:
                d = cand
                break
        tk = 128 * d
    return tm, M_pad, m_tiles, tn, tk


# --------------------------------- forward ----------------------------------

def flatten_head_forward(x, w_pad, b_pad, target_window, *,
                         compute_dtype=jnp.bfloat16):
    """x: [B, n_vars, d_model, patch_num]; w_pad/b_pad from
    prepare_flatten_head_params (same compute_dtype)."""
    B, n_vars, d_model, patch_num = x.shape
    nf = d_model * patch_num
    M = B * n_vars
    T = target_window
    T_pad, nf_pad = w_pad.shape
    assert b_pad.shape == (1, T_pad) and nf_pad >= nf and T_pad >= T
    out_dtype = x.dtype

    in_itemsize = jnp.dtype(compute_dtype).itemsize
    tm, M_pad, m_tiles, tn, tk = _choose_tiles(M, T_pad, nf_pad, in_itemsize)
    t_tiles = T_pad // tn
    k_tiles = nf_pad // tk

    # Flatten (row-major == torch Flatten(start_dim=-2)); pad only what's needed.
    x2d = x.reshape(M, nf).astype(compute_dtype)
    if (M_pad, nf_pad) != (M, nf):
        x2d = jnp.pad(x2d, ((0, M_pad - M), (0, nf_pad - nf)))

    cost = pl.CostEstimate(
        flops=2 * M_pad * nf_pad * T_pad,
        transcendentals=0,
        bytes_accessed=(in_itemsize * (M_pad * nf_pad + m_tiles * T_pad * nf_pad)
                        + 4 * T_pad
                        + jnp.dtype(out_dtype).itemsize * M_pad * T_pad),
    )
    cparams = pl.CompilerParams  # noqa: F841  (kept explicit below)

    if k_tiles == 1:
        # Fast path: whole reduction in one tile -> no accumulator, single store.
        out2d = pl.pallas_call(
            _fh_kernel_fullk,
            out_shape=jax.ShapeDtypeStruct((M_pad, T_pad), out_dtype),
            grid_spec=pltpu.PrefetchScalarGridSpec(
                num_scalar_prefetch=0,
                grid=(m_tiles, t_tiles),
                in_specs=[
                    pl.BlockSpec((tm, tk), lambda i, j: (i, 0)),   # activations
                    pl.BlockSpec((tn, tk), lambda i, j: (j, 0)),   # weight [T, nf]
                    pl.BlockSpec((1, tn), lambda i, j: (0, j)),    # bias
                ],
                out_specs=pl.BlockSpec((tm, tn), lambda i, j: (i, j)),
            ),
            compiler_params=pltpu.CompilerParams(
                dimension_semantics=("parallel", "parallel"),
                vmem_limit_bytes=32 * 1024 * 1024),
            cost_estimate=cost,
        )(x2d, w_pad, b_pad)
    else:
        # Large-nf fallback: K grid axis with a resident f32 accumulator.
        out2d = pl.pallas_call(
            _fh_kernel_ksplit,
            out_shape=jax.ShapeDtypeStruct((M_pad, T_pad), out_dtype),
            grid_spec=pltpu.PrefetchScalarGridSpec(
                num_scalar_prefetch=0,
                grid=(m_tiles, t_tiles, k_tiles),
                in_specs=[
                    pl.BlockSpec((tm, tk), lambda i, j, k: (i, k)),
                    pl.BlockSpec((tn, tk), lambda i, j, k: (j, k)),
                    pl.BlockSpec((1, tn), lambda i, j, k: (0, j)),
                ],
                out_specs=pl.BlockSpec((tm, tn), lambda i, j, k: (i, j)),
                scratch_shapes=[pltpu.VMEM((tm, tn), jnp.float32)],
            ),
            compiler_params=pltpu.CompilerParams(
                dimension_semantics=("parallel", "parallel", "arbitrary"),
                vmem_limit_bytes=32 * 1024 * 1024),
            cost_estimate=cost,
        )(x2d, w_pad, b_pad)

    out2d = out2d[:M, :T]
    # TODO(synk): training-mode dropout (head_dropout > 0) would need
    # pltpu.prng_seed / prng_random_bits masking; p=0 / eval mode is the identity.
    return out2d.reshape(B, n_vars, T)


if __name__ == "__main__":
    # Small, module-consistent shapes.
    B, n_vars, d_model, patch_num = 2, 4, 16, 8
    nf = d_model * patch_num          # 128
    target_window = 64

    key = jax.random.PRNGKey(0)
    kx, kw, kb = jax.random.split(key, 3)

    x = jax.random.normal(kx, (B, n_vars, d_model, patch_num), dtype=jnp.float32)

    # nn.Linear-style init: uniform(-1/sqrt(nf), 1/sqrt(nf)).
    bound = 1.0 / (nf ** 0.5)
    weight = jax.random.uniform(kw, (target_window, nf), jnp.float32, -bound, bound)
    bias = jax.random.uniform(kb, (target_window,), jnp.float32, -bound, bound)

    # One-time parameter prep (outside the hot path).
    w_pad, b_pad = prepare_flatten_head_params(weight, bias)

    out = flatten_head_forward(x, w_pad, b_pad, target_window)
    out = jax.block_until_ready(out)
    assert out.shape == (B, n_vars, target_window)
    assert out.dtype == x.dtype

    # Reference 1: same bf16-input / f32-accumulate math in plain JAX.
    xb = x.reshape(B * n_vars, nf).astype(jnp.bfloat16)
    wb = weight.astype(jnp.bfloat16)
    ref_bf16 = (lax.dot_general(xb, wb, (((1,), (1,)), ((), ())),
                                preferred_element_type=jnp.float32)
                + bias).reshape(B, n_vars, target_window).astype(x.dtype)
    assert jnp.allclose(out, ref_bf16, atol=1e-3, rtol=1e-3)

    # Reference 2: full-f32 reference, loose tolerance (bf16 input quantization).
    ref_f32 = x.reshape(B, n_vars, nf) @ weight.T + bias
    assert jnp.allclose(out, ref_f32, atol=5e-2, rtol=5e-2)

    # Optional full-precision path also supported (compute_dtype=f32).
    w_pad32, b_pad32 = prepare_flatten_head_params(weight, bias,
                                                   compute_dtype=jnp.float32)
    out_f32 = flatten_head_forward(x, w_pad32, b_pad32, target_window,
                                   compute_dtype=jnp.float32)
    out_f32 = jax.block_until_ready(out_f32)
    assert jnp.allclose(out_f32, ref_f32, atol=1e-4, rtol=1e-4)

    print("KERNEL_OK")
</pallas_src>

<mosaic_0001>
module attributes {stable_mosaic.version = 11 : i64} {
  func.func @_fh_kernel_fullk(%arg0: i32, %arg1: i32, %arg2: memref<16x128xbf16, #tpu.memory_space<vmem>>, %arg3: memref<128x128xbf16, #tpu.memory_space<vmem>>, %arg4: memref<1x128xf32, #tpu.memory_space<vmem>>, %arg5: memref<16x128xf32, #tpu.memory_space<vmem>>) attributes {dimension_semantics = [#tpu.dimension_semantics<parallel>, #tpu.dimension_semantics<parallel>], iteration_bounds = array<i64: 1, 1>, scalar_prefetch = 0 : i64, scratch_operands = 0 : i64, tpu.core_type = #tpu.core_type<tc>, window_params = [{transform_indices = @transform_0, window_bounds = array<i64: 16, 128>}, {transform_indices = @transform_1, window_bounds = array<i64: 128, 128>}, {transform_indices = @transform_2, window_bounds = array<i64: 1, 128>}, {transform_indices = @transform_3, window_bounds = array<i64: 16, 128>}]} {
    %c0 = arith.constant 0 : index
    %c0_0 = arith.constant 0 : index
    %0 = vector.load %arg2[%c0, %c0_0] : memref<16x128xbf16, #tpu.memory_space<vmem>>, vector<16x128xbf16>
    %c0_1 = arith.constant 0 : index
    %c0_2 = arith.constant 0 : index
    %1 = vector.load %arg3[%c0_1, %c0_2] : memref<128x128xbf16, #tpu.memory_space<vmem>>, vector<128x128xbf16>
    %cst = arith.constant dense<0.000000e+00> : vector<16x128xf32>
    %2 = tpu.matmul %0, %1, %cst {dimension_numbers = #tpu.dot_dimension_numbers<[1], [1], [0], [0], [0, 0, 1, 0], [], []>} : vector<16x128xbf16>, vector<128x128xbf16>, vector<16x128xf32> -> vector<16x128xf32>
    %c0_3 = arith.constant 0 : index
    %c0_4 = arith.constant 0 : index
    %3 = vector.load %arg4[%c0_3, %c0_4] : memref<1x128xf32, #tpu.memory_space<vmem>>, vector<1x128xf32>
    %4 = vector.broadcast %3 : vector<1x128xf32> to vector<16x128xf32>
    %5 = arith.addf %2, %4 : vector<16x128xf32>
    %c0_5 = arith.constant 0 : index
    %c0_6 = arith.constant 0 : index
    %6 = vector.load %arg5[%c0_5, %c0_6] : memref<16x128xf32, #tpu.memory_space<vmem>>, vector<16x128xf32>
    tpu.vector_store %arg5[%c0_5, %c0_6], %5 {strides = array<i32>} : memref<16x128xf32, #tpu.memory_space<vmem>>, vector<16x128xf32>,
    return
  }
  func.func @transform_0(%arg0: i32, %arg1: i32) -> (i32, i32) {
    %c0_i32 = arith.constant 0 : i32
    %c0_i32_0 = arith.constant 0 : i32
    return %arg0, %c0_i32 : i32, i32
  }
  func.func @transform_1(%arg0: i32, %arg1: i32) -> (i32, i32) {
    %c0_i32 = arith.constant 0 : i32
    %c0_i32_0 = arith.constant 0 : i32
    return %arg1, %c0_i32 : i32, i32
  }
  func.func @transform_2(%arg0: i32, %arg1: i32) -> (i32, i32) {
    %c0_i32 = arith.constant 0 : i32
    %c0_i32_0 = arith.constant 0 : i32
    return %c0_i32, %arg1 : i32, i32
  }
  func.func @transform_3(%arg0: i32, %arg1: i32) -> (i32, i32) {
    %c0_i32 = arith.constant 0 : i32
    return %arg0, %arg1 : i32, i32
  }
}

</mosaic_0001>

<bundles_post_ra>
// kernel: tpu_custom_call.1
= control target key start
LH: loop header
LB: loop body
LE: loop exit
PB: predicated region body
PF: predicated region fallthrough
CT: control target
= control target key end

     0   :  { %8 = vsyncpa [#allocation3], 0  ;;  %s381_s0 = inlined_call_operand.hbm [shape: bf16[16,128], index: 0, kind: input, shape index: {}]   ;;  %s382_s1 = inlined_call_operand.hbm [shape: bf16[128,128], index: 1, kind: input, shape index: {}]   ;;  %s383_s2 = inlined_call_operand.vmem [shape: f32[1,128], index: 2, kind: input, shape index: {}]   ;;  %s384_s3 = inlined_call_operand.hbm [shape: f32[16,128], index: 3, kind: output, shape index: {}]  }
   0x1   :  { %9 = vsyncpa [#allocation6], 0 }
   0x2   :  { %10 = vsyncpa [#allocation4], 0  ;;  %s313_s12 = smov [#allocation2]   ;;  %s241_s16 = scalar_lea.hbm %s381_s0, 128 }
   0x3   :  { %s16_s13 = sshll.u32 %s313_s12, 4  ;;  %p242_p0 = scmp.ne.s32.totalorder %s381_s0, %s241_s16  ;;  %s17_s13 = int_to_ptr.vmem [resolvable:$true] %s16_s13 }
   0x4   :  { %p245_p1 = scmp.lt.u32.totalorder %s241_s16, %s381_s0 }
   0x6   :  { %p247_p2 = pnand %p245_p1, %p242_p0 }
   0x8   :  { %250 = shalt.err (!%p247_p2)
}
   0x9   :  { %s251_s21 = scalar_lea.vmem %s17_s13, 128  ;;  %p256_p4 = scmp.lt.s32.totalorder %s17_s13, %s17_s13 }
   0xa   :  { %p252_p3 = scmp.ne.s32.totalorder %s17_s13, %s251_s21  ;;  %p257_p5 = scmp.lt.s32.totalorder %s251_s21, %s251_s21 }
   0xc   :  { %p258_p6 = por %p257_p5, %p256_p4 }
   0xe   :  { %p259_p7 = pnand %p258_p6, %p252_p3 }
  0x10   :  { %262 = shalt.err (!%p259_p7)
}
  0x11   :  { %s314_s22 = smov 64   ;;  %s315_s23 = smov 4  }
  0x12   :  { %22 = dma.hbm_to_vmem [thread:$0]  %s381_s0, 128, %s17_s13, [#allocation3], %s314_s22, %s314_s22, %s315_s23  }
  0x13   :  { %s316_s26 = smov [#allocation5]   ;;  %s263_s30 = scalar_lea.hbm %s382_s1, 1024 }
  0x14   :  { %s28_s27 = sshll.u32 %s316_s26, 4  ;;  %p264_p8 = scmp.ne.s32.totalorder %s382_s1, %s263_s30  ;;  %s29_s27 = int_to_ptr.vmem [resolvable:$true] %s28_s27 }
  0x15   :  { %p267_p9 = scmp.lt.u32.totalorder %s263_s30, %s382_s1 }
  0x17   :  { %p269_p10 = pnand %p267_p9, %p264_p8 }
  0x19   :  { %272 = shalt.err (!%p269_p10)
}
  0x1a   :  { %s273_s8 = scalar_lea.vmem %s29_s27, 1024  ;;  %p278_p12 = scmp.lt.s32.totalorder %s29_s27, %s29_s27 }
  0x1b   :  { %p274_p11 = scmp.ne.s32.totalorder %s29_s27, %s273_s8  ;;  %p279_p13 = scmp.lt.s32.totalorder %s273_s8, %s273_s8 }
  0x1d   :  { %p280_p0 = por %p279_p13, %p278_p12 }
  0x1f   :  { %p281_p1 = pnand %p280_p0, %p274_p11 }
  0x21   :  { %284 = shalt.err (!%p281_p1)
}
  0x22   :  { %34 = dma.hbm_to_vmem [thread:$0]  %s382_s1, 1024, %s29_s27, [#allocation6], %s314_s22, %s314_s22, %s315_s23  }
  0x23   :  { %307 = dma.done.wait [#allocation3], 128  }
  0x24   :  { %308 = vsyncadd [#allocation3], 4294967168 }
  0x25   :  { %309 = dma.done.wait [#allocation6], 1024  }
  0x26   :  { %310 = vsyncadd [#allocation6], 4294966272  ;;  %v317_v0 = vmov 0.0   ;;  %vm318_vm0 = vmmov 0   ;;  %v232_v1 = vld [vmem:[#allocation5] sm:$0xff]   ;;  %v233_v2 = vld [vmem:[#allocation5 + $0x8] sm:$0xff]  }
  0x27   :  { %203 = vmatprep.subr.bf16.mxu0 %v317_v0  ;;  %219 = vmatprep.mubr.msk.bf16.mxu0 %vm318_vm0, %v317_v0  ;;  %v234_v3 = vld [vmem:[#allocation5 + $0x10] sm:$0xff]   ;;  %v235_v4 = vld [vmem:[#allocation5 + $0x18] sm:$0xff]   ;;  %v236_v5 = vld [vmem:[#allocation5 + $0x20] sm:$0xff]   ;;  %s319_s11 = smov [#allocation7]  }
  0x28   :  { %204 = vmatpush3.bf16.xpose.msra.mxu0 %v232_v1  ;;  %v237_v6 = vld [vmem:[#allocation5 + $0x28] sm:$0xff]   ;;  %v238_v7 = vld [vmem:[#allocation5 + $0x30] sm:$0xff]   ;;  %v239_v8 = vld [vmem:[#allocation5 + $0x38] sm:$0xff]   ;;  %s171_s12 = sshll.u32 %s319_s11, 4  ;;  %s172_s12 = int_to_ptr.vmem [resolvable:$true] %s171_s12 }
  0x29   :  { %205 = vmatprep.subr.bf16.mxu0 %v317_v0  ;;  %v240_v9 = vld [vmem:[#allocation2] sm:$0xff]   ;;  %s285_s13 = scalar_lea.vmem %s172_s12, 256  ;;  %p290_p3 = scmp.lt.s32.totalorder %s172_s12, %s172_s12 }
  0x2a   :  { %v184_v10 = vld [vmem:[%s383_s2] ss:$0 sm:$0xff]  ;;  %p286_p2 = scmp.ne.s32.totalorder %s172_s12, %s285_s13  ;;  %p291_p4 = scmp.lt.s32.totalorder %s285_s13, %s285_s13 }
  0x2c   :  { %p292_p5 = por %p291_p4, %p290_p3 }
  0x2e   :  { %p293_p6 = pnand %p292_p5, %p286_p2 }
  0x30   :  { %206 = vmatpush3.bf16.xpose.msra.mxu0 %v233_v2 }
  0x31   :  { %207 = vmatprep.subr.bf16.mxu0 %v317_v0 }
  0x38   :  { %208 = vmatpush3.bf16.xpose.msra.mxu0 %v234_v3 }
  0x39   :  { %209 = vmatprep.subr.bf16.mxu0 %v317_v0 }
  0x40   :  { %210 = vmatpush3.bf16.xpose.msra.mxu0 %v235_v4 }
  0x41   :  { %211 = vmatprep.subr.bf16.mxu0 %v317_v0 }
  0x48   :  { %212 = vmatpush3.bf16.xpose.msra.mxu0 %v236_v5 }
  0x49   :  { %213 = vmatprep.subr.bf16.mxu0 %v317_v0 }
  0x50   :  { %214 = vmatpush3.bf16.xpose.msra.mxu0 %v237_v6 }
  0x51   :  { %215 = vmatprep.subr.bf16.mxu0 %v317_v0 }
  0x58   :  { %216 = vmatpush3.bf16.xpose.msra.mxu0 %v238_v7 }
  0x59   :  { %217 = vmatprep.subr.bf16.mxu0 %v317_v0 }
  0x60   :  { %218 = vmatpush3.bf16.xpose.msra.mxu0 %v239_v8 }
  0x67   :  { %220 = vmatmul.mubr.bf16.vlgmr.msra.gmra.mrb[0].mxu0 %v240_v9 }
 0x13a   :  { %v157_v11 = vpop.f32.mrb[0].mxu0 }
 0x13b   :  { %v158_v12 = vadd.f32 %v184_v10, %v157_v11  ;;  %v221_v13 = vpop.f32.mrb[1].mxu0 }
 0x13c   :  { %v160_v14 = vpop.f32.mrb[2].mxu0 }
 0x13d   :  { %164 = vst [vmem:[#allocation7] sm:$0xff] %v158_v12  ;;  %v161_v15 = vadd.f32 %v184_v10, %v160_v14  ;;  %v222_v16 = vpop.f32.mrb[3].mxu0 }
 0x13f   :  { %165 = vst [vmem:[#allocation7 + $0x8] sm:$0xff] %v161_v15 }
 0x140   :  { %296 = shalt.err (!%p293_p6)
}
 0x141   :  { %s297_s15 = scalar_lea.hbm %s384_s3, 256 }
 0x142   :  { %p298_p7 = scmp.ne.s32.totalorder %s384_s3, %s297_s15  ;;  %p301_p8 = scmp.lt.u32.totalorder %s297_s15, %s384_s3 }
 0x144   :  { %p303_p9 = pnand %p301_p8, %p298_p7 }
 0x146   :  { %306 = shalt.err (!%p303_p9)
}
 0x147   :  { %s320_s20 = smov 128   ;;  %s321_s21 = smov 8  }
 0x148   :  { %177 = dma.vmem_to_hbm [thread:$0]  %s172_s12, 256, %s384_s3, [#allocation4], %s320_s20, %s320_s20, %s321_s21  }
 0x149   :  { %311 = dma.done.wait [#allocation4], 256  }
 0x14a   :  { %312 = vsyncadd [#allocation4], 4294967040 }
 0x14b   :  { %181 = vsyncpa [#allocation3], 1 }
 0x14c   :  { %182 = vsyncpa [#allocation6], 1 }
 0x14d   :  { %183 = vsyncpa [#allocation4], 1 }

</bundles_post_ra>
